<compile_context>
chip_gen: v6e
topology: v6e:2x2x1
jax: 0.10.0
libtpu: 0.0.40
codegen_flags: <defaults>
</compile_context>

<pallas_src>
import math
from functools import partial

import jax
import jax.numpy as jnp
from jax.experimental import pallas as pl
from jax.experimental.pallas import tpu as pltpu


def _round_up(x, m):
    return (x + m - 1) // m * m


def _stats_rows(vals):
    """Pack [sum; sum-of-squares] of `vals` over axis 0 into an (8, N) block."""
    ssum = jnp.sum(vals, axis=0, keepdims=True)            # (1, N)
    ssq = jnp.sum(vals * vals, axis=0, keepdims=True)      # (1, N)
    row = jax.lax.broadcasted_iota(jnp.int32, (8, 1), 0)
    return jnp.where(row == 0, ssum, 0.0) + jnp.where(row == 1, ssq, 0.0)


# ----------------------------- Pallas kernels ------------------------------

def _stats1_kernel(x_ref, w_ref, b_ref, s_ref, *, m_true, tm, need_mask):
    """Stats-only pass: sum / sumsq over M of h = x @ W1 + b1 (h not stored)."""
    h = jnp.dot(x_ref[...].astype(jnp.bfloat16), w_ref[...],
                preferred_element_type=jnp.float32) + b_ref[...]
    if need_mask:
        i = pl.program_id(0)
        rows = jax.lax.broadcasted_iota(jnp.int32, (tm, 1), 0) + i * tm
        h = jnp.where(rows < m_true, h, 0.0)
    s_ref[...] = _stats_rows(h)


def _mlp_stats_kernel(x_ref, w1_ref, sc1_ref, sh1_ref, w2_ref, b2_ref,
                      y_ref, s_ref, *, m_true, tm, need_mask):
    """Recompute x@W1, apply folded BN1 (scale/shift) + ReLU, second matmul,
    write y (bf16) and its per-tile stats."""
    h = jnp.dot(x_ref[...].astype(jnp.bfloat16), w1_ref[...],
                preferred_element_type=jnp.float32)
    h = jnp.maximum(h * sc1_ref[...] + sh1_ref[...], 0.0)
    y = jnp.dot(h.astype(jnp.bfloat16), w2_ref[...],
                preferred_element_type=jnp.float32) + b2_ref[...]
    y_ref[...] = y.astype(y_ref.dtype)
    if need_mask:
        i = pl.program_id(0)
        rows = jax.lax.broadcasted_iota(jnp.int32, (tm, 1), 0) + i * tm
        y = jnp.where(rows < m_true, y, 0.0)
    s_ref[...] = _stats_rows(y)


def _bn_final_kernel(y_ref, mu_ref, inv_ref, o_ref):
    """BatchNorm1d(affine=False): normalize y with precomputed mean / inv-std."""
    o_ref[...] = (y_ref[...].astype(jnp.float32) - mu_ref[...]) * inv_ref[...]


def _fused_small_kernel(x_ref, w1_ref, b1_ref, g1_ref, be1_ref, w2_ref, b2_ref,
                        o_ref, *, m_true, eps, need_mask):
    """Whole head in one VMEM-resident kernel (small-M fast path)."""
    inv_m = 1.0 / m_true
    if need_mask:
        rows = jax.lax.broadcasted_iota(jnp.int32, (x_ref.shape[0], 1), 0)
        valid = rows < m_true

    def bn_stats(v):
        vm = jnp.where(valid, v, 0.0) if need_mask else v
        mu = jnp.sum(vm, axis=0, keepdims=True) * inv_m
        d = v - mu
        if need_mask:
            d = jnp.where(valid, d, 0.0)
        var = jnp.sum(d * d, axis=0, keepdims=True) * inv_m
        return mu, var

    h = jnp.dot(x_ref[...].astype(jnp.bfloat16), w1_ref[...],
                preferred_element_type=jnp.float32) + b1_ref[...]
    mu1, var1 = bn_stats(h)
    h = (h - mu1) * jax.lax.rsqrt(var1 + eps) * g1_ref[...] + be1_ref[...]
    h = jnp.maximum(h, 0.0)

    y = jnp.dot(h.astype(jnp.bfloat16), w2_ref[...],
                preferred_element_type=jnp.float32) + b2_ref[...]
    mu2, var2 = bn_stats(y)
    o_ref[...] = (y - mu2) * jax.lax.rsqrt(var2 + eps)


# ------------------------------ wrapper -------------------------------------

def local_embedding(x, params, *, eps=1e-5, max_tile_m=512,
                    small_m_threshold=512):
    """LocalEmbedding.forward: x [B, S, Din] -> [B, S, Dout]."""
    B, S, Din = x.shape
    M = B * S
    H = params["w1"].shape[1]
    Dout = params["w2"].shape[1]

    xm = x.reshape(M, Din).astype(jnp.float32)
    w1 = params["w1"].astype(jnp.bfloat16)
    w2 = params["w2"].astype(jnp.bfloat16)
    b1 = params["b1"].reshape(1, H).astype(jnp.float32)
    b2 = params["b2"].reshape(1, Dout).astype(jnp.float32)
    g1 = params["g1"].reshape(1, H).astype(jnp.float32)
    be1 = params["be1"].reshape(1, H).astype(jnp.float32)

    # ---------- fast path: everything fits comfortably in VMEM -------------
    Mp = _round_up(M, 8)
    fast_bytes = (4 * Mp * (Din + H + Dout)            # x, h, y resident (f32)
                  + 2 * (Din * H + H * Dout)           # bf16 weights
                  + 16 * max(H, Dout))                 # small vectors
    if M <= small_m_threshold and fast_bytes < 8 * 1024 * 1024:
        xp = xm if Mp == M else jnp.pad(xm, ((0, Mp - M), (0, 0)))
        out = pl.pallas_call(
            partial(_fused_small_kernel, m_true=M, eps=eps,
                    need_mask=(Mp != M)),
            out_shape=jax.ShapeDtypeStruct((Mp, Dout), jnp.float32),
        )(xp, w1, b1, g1, be1, w2, b2)
        return out[:M].reshape(B, S, Dout)

    # ---------- tiled 3-pass path -------------------------------------------
    tm = min(max_tile_m, _round_up(M, 16))
    Mpad = _round_up(M, tm)
    ntiles = Mpad // tm
    need_mask = (Mpad != M)
    if need_mask:
        xm = jnp.pad(xm, ((0, Mpad - M), (0, 0)))

    cp_par = pltpu.CompilerParams(dimension_semantics=("parallel",),
                                  vmem_limit_bytes=32 * 1024 * 1024)

    # Pass 1: per-tile partial stats of h = x @ W1 + b1 (h never stored).
    s1 = pl.pallas_call(
        partial(_stats1_kernel, m_true=M, tm=tm, need_mask=need_mask),
        out_shape=jax.ShapeDtypeStruct((ntiles * 8, H), jnp.float32),
        grid=(ntiles,),
        in_specs=[pl.BlockSpec((tm, Din), lambda i: (i, 0)),
                  pl.BlockSpec((Din, H), lambda i: (0, 0)),
                  pl.BlockSpec((1, H), lambda i: (0, 0))],
        out_specs=pl.BlockSpec((8, H), lambda i: (i, 0)),
        compiler_params=cp_par,
    )(xm, w1, b1)

    # Fold BN1 into a per-channel scale/shift (plain JAX on tiny arrays).
    s1_tot = jnp.sum(s1.reshape(ntiles, 8, H), axis=0)
    mu1 = s1_tot[0:1] / M
    var1 = jnp.maximum(s1_tot[1:2] / M - mu1 * mu1, 0.0)
    scale1 = g1 * jax.lax.rsqrt(var1 + eps)              # (1, H)
    shift1 = (b1 - mu1) * scale1 + be1                   # (1, H)

    # Pass 2: recompute x@W1, BN1 (folded) + ReLU, y = .@W2 + b2 (bf16 out),
    # plus per-tile partial stats of y.
    y, s2 = pl.pallas_call(
        partial(_mlp_stats_kernel, m_true=M, tm=tm, need_mask=need_mask),
        out_shape=(jax.ShapeDtypeStruct((Mpad, Dout), jnp.bfloat16),
                   jax.ShapeDtypeStruct((ntiles * 8, Dout), jnp.float32)),
        grid=(ntiles,),
        in_specs=[pl.BlockSpec((tm, Din), lambda i: (i, 0)),
                  pl.BlockSpec((Din, H), lambda i: (0, 0)),
                  pl.BlockSpec((1, H), lambda i: (0, 0)),
                  pl.BlockSpec((1, H), lambda i: (0, 0)),
                  pl.BlockSpec((H, Dout), lambda i: (0, 0)),
                  pl.BlockSpec((1, Dout), lambda i: (0, 0))],
        out_specs=(pl.BlockSpec((tm, Dout), lambda i: (i, 0)),
                   pl.BlockSpec((8, Dout), lambda i: (i, 0))),
        compiler_params=cp_par,
    )(xm, w1, scale1, shift1, w2, b2)

    s2_tot = jnp.sum(s2.reshape(ntiles, 8, Dout), axis=0)
    mu2 = s2_tot[0:1] / M
    var2 = jnp.maximum(s2_tot[1:2] / M - mu2 * mu2, 0.0)
    inv2 = jax.lax.rsqrt(var2 + eps)                     # (1, Dout)

    # Pass 3: BN2 (affine=False) normalize.
    out = pl.pallas_call(
        _bn_final_kernel,
        out_shape=jax.ShapeDtypeStruct((Mpad, Dout), jnp.float32),
        grid=(ntiles,),
        in_specs=[pl.BlockSpec((tm, Dout), lambda i: (i, 0)),
                  pl.BlockSpec((1, Dout), lambda i: (0, 0)),
                  pl.BlockSpec((1, Dout), lambda i: (0, 0))],
        out_specs=pl.BlockSpec((tm, Dout), lambda i: (i, 0)),
        compiler_params=cp_par,
    )(y, mu2, inv2)

    return out[:M].reshape(B, S, Dout)


# ---------------------------- pure-JAX reference -----------------------------

def local_embedding_ref(x, params, eps=1e-5):
    """PyTorch-faithful (training-mode BN, centered variance) reference with
    bf16 matmuls / f32 accumulation to match the kernel's MXU precision."""
    B, S, Din = x.shape
    xm = x.reshape(B * S, Din).astype(jnp.float32)
    h = jnp.dot(xm.astype(jnp.bfloat16), params["w1"].astype(jnp.bfloat16),
                preferred_element_type=jnp.float32) + params["b1"]
    mu = jnp.mean(h, axis=0, keepdims=True)
    var = jnp.mean((h - mu) ** 2, axis=0, keepdims=True)
    h = (h - mu) * jax.lax.rsqrt(var + eps) * params["g1"] + params["be1"]
    h = jnp.maximum(h, 0.0)
    y = jnp.dot(h.astype(jnp.bfloat16), params["w2"].astype(jnp.bfloat16),
                preferred_element_type=jnp.float32) + params["b2"]
    mu2 = jnp.mean(y, axis=0, keepdims=True)
    var2 = jnp.mean((y - mu2) ** 2, axis=0, keepdims=True)
    out = (y - mu2) * jax.lax.rsqrt(var2 + eps)
    return out.reshape(B, S, -1)


def init_params(key, din, dh, dout):
    k1, k2, k3, k4 = jax.random.split(key, 4)
    s1 = 1.0 / math.sqrt(din)
    s2 = 1.0 / math.sqrt(dh)
    return dict(
        w1=jax.random.uniform(k1, (din, dh), jnp.float32, -s1, s1),
        b1=jax.random.uniform(k2, (dh,), jnp.float32, -s1, s1),
        g1=jnp.ones((dh,), jnp.float32),    # BatchNorm1d weight (train init)
        be1=jnp.zeros((dh,), jnp.float32),  # BatchNorm1d bias
        w2=jax.random.uniform(k3, (dh, dout), jnp.float32, -s2, s2),
        b2=jax.random.uniform(k4, (dout,), jnp.float32, -s2, s2),
    )


# ---------------------------------- main ------------------------------------

if __name__ == "__main__":
    input_dim, hidden_dim, output_dim = 128, 256, 128  # lane-dense (x128)

    key = jax.random.PRNGKey(0)
    kx, kp, kx2 = jax.random.split(key, 3)
    params = init_params(kp, input_dim, hidden_dim, output_dim)
    fwd = jax.jit(local_embedding)

    # Small case -> single fused-VMEM kernel fast path.
    B, S = 2, 8
    x_small = jax.random.normal(kx, (B, S, input_dim), jnp.float32)
    out_small = jax.block_until_ready(fwd(x_small, params))
    ref_small = local_embedding_ref(x_small, params)
    assert out_small.shape == (B, S, output_dim)
    err_small = float(jnp.max(jnp.abs(out_small - ref_small)))
    assert err_small < 1e-2, f"fast-path max abs err vs reference: {err_small}"

    # Larger case -> tiled 3-pass pipeline (exercises tiling + row masking).
    # Tolerance 3e-2: the y intermediate is stored in bf16 (~2^-8 relative),
    # which after the affine-free BN2 normalization bounds the deviation at
    # roughly 2^-8 * max|y| / std(y) ~ 2e-2 in the worst tail element.
    B2, S2 = 4, 500
    x_big = jax.random.normal(kx2, (B2, S2, input_dim), jnp.float32)
    out_big = jax.block_until_ready(fwd(x_big, params))
    ref_big = local_embedding_ref(x_big, params)
    assert out_big.shape == (B2, S2, output_dim)
    err_big = float(jnp.max(jnp.abs(out_big - ref_big)))
    assert err_big < 3e-2, f"tiled-path max abs err vs reference: {err_big}"

    print("KERNEL_OK")
</pallas_src>

<mosaic_0001>
module attributes {stable_mosaic.version = 11 : i64} {
  func.func @_fused_small_kernel(%arg0: memref<16x128xf32, #tpu.memory_space<vmem>>, %arg1: memref<128x256xbf16, #tpu.memory_space<vmem>>, %arg2: memref<1x256xf32, #tpu.memory_space<vmem>>, %arg3: memref<1x256xf32, #tpu.memory_space<vmem>>, %arg4: memref<1x256xf32, #tpu.memory_space<vmem>>, %arg5: memref<256x128xbf16, #tpu.memory_space<vmem>>, %arg6: memref<1x128xf32, #tpu.memory_space<vmem>>, %arg7: memref<16x128xf32, #tpu.memory_space<vmem>>) attributes {dimension_semantics = [], scalar_prefetch = 0 : i64, scratch_operands = 0 : i64, tpu.core_type = #tpu.core_type<tc>} {
    %c0 = arith.constant 0 : index
    %c0_0 = arith.constant 0 : index
    %0 = vector.load %arg0[%c0, %c0_0] : memref<16x128xf32, #tpu.memory_space<vmem>>, vector<16x128xf32>
    %1 = arith.truncf %0 : vector<16x128xf32> to vector<16x128xbf16>
    %c0_1 = arith.constant 0 : index
    %c0_2 = arith.constant 0 : index
    %2 = vector.load %arg1[%c0_1, %c0_2] : memref<128x256xbf16, #tpu.memory_space<vmem>>, vector<128x256xbf16>
    %cst = arith.constant dense<0.000000e+00> : vector<16x256xf32>
    %3 = tpu.matmul %1, %2, %cst {dimension_numbers = #tpu.dot_dimension_numbers<[1], [0], [0], [1], [0, 0, 1, 1], [], []>} : vector<16x128xbf16>, vector<128x256xbf16>, vector<16x256xf32> -> vector<16x256xf32>
    %c0_3 = arith.constant 0 : index
    %c0_4 = arith.constant 0 : index
    %4 = vector.load %arg2[%c0_3, %c0_4] : memref<1x256xf32, #tpu.memory_space<vmem>>, vector<1x256xf32>
    %5 = vector.broadcast %4 : vector<1x256xf32> to vector<16x256xf32>
    %6 = arith.addf %3, %5 : vector<16x256xf32>
    %cst_5 = arith.constant dense<0.000000e+00> : vector<256xf32>
    %7 = vector.multi_reduction <add>, %6, %cst_5 [0] : vector<16x256xf32> to vector<256xf32>
    %8 = vector.shape_cast %7 : vector<256xf32> to vector<1x256xf32>
    %cst_6 = arith.constant 6.250000e-02 : f32
    %9 = vector.broadcast %cst_6 : f32 to vector<1x256xf32>
    %10 = arith.mulf %8, %9 : vector<1x256xf32>
    %11 = vector.broadcast %10 : vector<1x256xf32> to vector<16x256xf32>
    %12 = arith.subf %6, %11 : vector<16x256xf32>
    %13 = arith.mulf %12, %12 : vector<16x256xf32>
    %cst_7 = arith.constant dense<0.000000e+00> : vector<256xf32>
    %14 = vector.multi_reduction <add>, %13, %cst_7 [0] : vector<16x256xf32> to vector<256xf32>
    %15 = vector.shape_cast %14 : vector<256xf32> to vector<1x256xf32>
    %cst_8 = arith.constant 6.250000e-02 : f32
    %16 = vector.broadcast %cst_8 : f32 to vector<1x256xf32>
    %17 = arith.mulf %15, %16 : vector<1x256xf32>
    %18 = vector.broadcast %10 : vector<1x256xf32> to vector<16x256xf32>
    %19 = arith.subf %6, %18 : vector<16x256xf32>
    %cst_9 = arith.constant 9.99999974E-6 : f32
    %20 = vector.broadcast %cst_9 : f32 to vector<1x256xf32>
    %21 = arith.addf %17, %20 : vector<1x256xf32>
    %22 = math.rsqrt %21 : vector<1x256xf32>
    %23 = vector.broadcast %22 : vector<1x256xf32> to vector<16x256xf32>
    %24 = arith.mulf %19, %23 : vector<16x256xf32>
    %c0_10 = arith.constant 0 : index
    %c0_11 = arith.constant 0 : index
    %25 = vector.load %arg3[%c0_10, %c0_11] : memref<1x256xf32, #tpu.memory_space<vmem>>, vector<1x256xf32>
    %26 = vector.broadcast %25 : vector<1x256xf32> to vector<16x256xf32>
    %27 = arith.mulf %24, %26 : vector<16x256xf32>
    %c0_12 = arith.constant 0 : index
    %c0_13 = arith.constant 0 : index
    %28 = vector.load %arg4[%c0_12, %c0_13] : memref<1x256xf32, #tpu.memory_space<vmem>>, vector<1x256xf32>
    %29 = vector.broadcast %28 : vector<1x256xf32> to vector<16x256xf32>
    %30 = arith.addf %27, %29 : vector<16x256xf32>
    %cst_14 = arith.constant 0.000000e+00 : f32
    %31 = vector.broadcast %cst_14 : f32 to vector<16x256xf32>
    %32 = arith.maximumf %30, %31 : vector<16x256xf32>
    %33 = arith.truncf %32 : vector<16x256xf32> to vector<16x256xbf16>
    %c0_15 = arith.constant 0 : index
    %c0_16 = arith.constant 0 : index
    %34 = vector.load %arg5[%c0_15, %c0_16] : memref<256x128xbf16, #tpu.memory_space<vmem>>, vector<256x128xbf16>
    %cst_17 = arith.constant dense<0.000000e+00> : vector<16x128xf32>
    %35 = tpu.matmul %33, %34, %cst_17 {dimension_numbers = #tpu.dot_dimension_numbers<[1], [0], [0], [1], [0, 0, 1, 1], [], []>} : vector<16x256xbf16>, vector<256x128xbf16>, vector<16x128xf32> -> vector<16x128xf32>
    %c0_18 = arith.constant 0 : index
    %c0_19 = arith.constant 0 : index
    %36 = vector.load %arg6[%c0_18, %c0_19] : memref<1x128xf32, #tpu.memory_space<vmem>>, vector<1x128xf32>
    %37 = vector.broadcast %36 : vector<1x128xf32> to vector<16x128xf32>
    %38 = arith.addf %35, %37 : vector<16x128xf32>
    %cst_20 = arith.constant dense<0.000000e+00> : vector<128xf32>
    %39 = vector.multi_reduction <add>, %38, %cst_20 [0] : vector<16x128xf32> to vector<128xf32>
    %40 = vector.shape_cast %39 : vector<128xf32> to vector<1x128xf32>
    %cst_21 = arith.constant 6.250000e-02 : f32
    %41 = vector.broadcast %cst_21 : f32 to vector<1x128xf32>
    %42 = arith.mulf %40, %41 : vector<1x128xf32>
    %43 = vector.broadcast %42 : vector<1x128xf32> to vector<16x128xf32>
    %44 = arith.subf %38, %43 : vector<16x128xf32>
    %45 = arith.mulf %44, %44 : vector<16x128xf32>
    %cst_22 = arith.constant dense<0.000000e+00> : vector<128xf32>
    %46 = vector.multi_reduction <add>, %45, %cst_22 [0] : vector<16x128xf32> to vector<128xf32>
    %47 = vector.shape_cast %46 : vector<128xf32> to vector<1x128xf32>
    %cst_23 = arith.constant 6.250000e-02 : f32
    %48 = vector.broadcast %cst_23 : f32 to vector<1x128xf32>
    %49 = arith.mulf %47, %48 : vector<1x128xf32>
    %50 = vector.broadcast %42 : vector<1x128xf32> to vector<16x128xf32>
    %51 = arith.subf %38, %50 : vector<16x128xf32>
    %cst_24 = arith.constant 9.99999974E-6 : f32
    %52 = vector.broadcast %cst_24 : f32 to vector<1x128xf32>
    %53 = arith.addf %49, %52 : vector<1x128xf32>
    %54 = math.rsqrt %53 : vector<1x128xf32>
    %55 = vector.broadcast %54 : vector<1x128xf32> to vector<16x128xf32>
    %56 = arith.mulf %51, %55 : vector<16x128xf32>
    %c0_25 = arith.constant 0 : index
    %c0_26 = arith.constant 0 : index
    %57 = vector.load %arg7[%c0_25, %c0_26] : memref<16x128xf32, #tpu.memory_space<vmem>>, vector<16x128xf32>
    tpu.vector_store %arg7[%c0_25, %c0_26], %56 {strides = array<i32>} : memref<16x128xf32, #tpu.memory_space<vmem>>, vector<16x128xf32>,
    return
  }
}

</mosaic_0001>

<bundles_post_ra>
// kernel: local_embedding.1
= control target key start
LH: loop header
LB: loop body
LE: loop exit
PB: predicated region body
PF: predicated region fallthrough
CT: control target
= control target key end

     0   :  { %v613_v2 = vmov 0   ;;  %s784_s0 = inlined_call_operand.vmem [shape: f32[16,128], index: 0, kind: input, shape index: {}]   ;;  %s785_s1 = inlined_call_operand.vmem [shape: bf16[128,256], index: 1, kind: input, shape index: {}]   ;;  %s786_s2 = inlined_call_operand.vmem [shape: f32[1,256], index: 2, kind: input, shape index: {}]   ;;  %s787_s3 = inlined_call_operand.vmem [shape: f32[1,256], index: 3, kind: input, shape index: {}]   ;;  %s788_s4 = inlined_call_operand.vmem [shape: f32[1,256], index: 4, kind: input, shape index: {}]   ;;  %s789_s5 = inlined_call_operand.vmem [shape: bf16[256,128], index: 5, kind: input, shape index: {}]   ;;  %s790_s6 = inlined_call_operand.vmem [shape: f32[1,128], index: 6, kind: input, shape index: {}]   ;;  %s791_s7 = inlined_call_operand.hbm [shape: f32[16,128], index: 7, kind: output, shape index: {}]  }
   0x1   :  { %v545_v0 = vld [vmem:[%s785_s1 + $0x74] ss:$8 sps:$4 sm:$0xff]   ;;  %v547_v1 = vld [vmem:[%s785_s1 + $0x70] ss:$8 sps:$4 sm:$0xff]   ;;  %171 = vmatprep.mubr.bf16.mxu0 %v613_v2  ;;  %v548_v3 = vld [vmem:[%s785_s1 + $0x64] ss:$8 sps:$4 sm:$0xff]  }
   0x2   :  { %139 = vmatprep.subr.bf16.mxu0 %v545_v0  ;;  %v550_v4 = vld [vmem:[%s785_s1 + $0x60] ss:$8 sps:$4 sm:$0xff]   ;;  %v551_v5 = vld [vmem:[%s785_s1 + $0x54] ss:$8 sps:$4 sm:$0xff]   ;;  %v553_v6 = vld [vmem:[%s785_s1 + $0x50] ss:$8 sps:$4 sm:$0xff]  }
   0x3   :  { %140 = vmatpush1.bf16.msra.mxu0 %v547_v1  ;;  %v554_v7 = vld [vmem:[%s785_s1 + $0x44] ss:$8 sps:$4 sm:$0xff]   ;;  %v556_v8 = vld [vmem:[%s785_s1 + $0x40] ss:$8 sps:$4 sm:$0xff]   ;;  %v557_v9 = vld [vmem:[%s785_s1 + $0x34] ss:$8 sps:$4 sm:$0xff]  }
   0x4   :  { %141 = vmatprep.subr.bf16.mxu0 %v548_v3  ;;  %v559_v10 = vld [vmem:[%s785_s1 + $0x30] ss:$8 sps:$4 sm:$0xff]   ;;  %v560_v11 = vld [vmem:[%s785_s1 + $0x24] ss:$8 sps:$4 sm:$0xff]   ;;  %v562_v12 = vld [vmem:[%s785_s1 + $0x20] ss:$8 sps:$4 sm:$0xff]  }
   0x5   :  { %v563_v13 = vld [vmem:[%s785_s1 + $0x14] ss:$8 sps:$4 sm:$0xff]  }
   0x7   :  { %142 = vmatpush1.bf16.msra.mxu0 %v550_v4 }
   0x8   :  { %143 = vmatprep.subr.bf16.mxu0 %v551_v5 }
   0xb   :  { %144 = vmatpush1.bf16.msra.mxu0 %v553_v6 }
   0xc   :  { %145 = vmatprep.subr.bf16.mxu0 %v554_v7 }
   0xf   :  { %146 = vmatpush1.bf16.msra.mxu0 %v556_v8 }
  0x10   :  { %147 = vmatprep.subr.bf16.mxu0 %v557_v9 }
  0x13   :  { %148 = vmatpush1.bf16.msra.mxu0 %v559_v10 }
  0x14   :  { %149 = vmatprep.subr.bf16.mxu0 %v560_v11 }
  0x15   :  { %12 = vsyncpa [#allocation3], 0  ;;  %v565_v14 = vld [vmem:[%s785_s1 + $0x10] ss:$8 sps:$4 sm:$0xff]   ;;  %v566_v15 = vld [vmem:[%s785_s1 + $0x4] ss:$8 sps:$4 sm:$0xff]   ;;  %v49_v36 = vlaneseq }
  0x16   :  { %v568_v16 = vld [vmem:[%s785_s1] ss:$8 sps:$4 sm:$0xff]   ;;  %v569_v20 = vld [vmem:[%s789_s5 + $0x78] sm:$0xff]   ;;  %v571_v22 = vld [vmem:[%s789_s5 + $0x70] sm:$0xff]  }
  0x17   :  { %150 = vmatpush1.bf16.msra.mxu0 %v562_v12  ;;  %v28_v17 = vld [vmem:[%s784_s0] sm:$0xff]  ;;  %v29_v18 = vld [vmem:[%s784_s0 + $0x8] sm:$0xff]  ;;  %v570_v21 = vld [vmem:[%s789_s5 + $0x38] sm:$0xff]   ;;  %519 = vmatprep.subr.bf16.mxu1 %v569_v20  ;;  %v50_v37 = vshrl.u32 %v49_v36, 7 }
  0x18   :  { %151 = vmatprep.subr.bf16.mxu0 %v563_v13  ;;  %v30_v19 = vpack.c.bf16 %v29_v18, %v28_v17  ;;  %520 = vmatpush3.bf16.msra.mxu1 %v570_v21  ;;  %v572_v23 = vld [vmem:[%s789_s5 + $0x30] sm:$0xff]   ;;  %v573_v24 = vld [vmem:[%s789_s5 + $0x68] sm:$0xff]   ;;  %v575_v26 = vld [vmem:[%s789_s5 + $0x60] sm:$0xff]  }
  0x19   :  { %521 = vmatprep.subr.bf16.mxu1 %v571_v22  ;;  %v574_v25 = vld [vmem:[%s789_s5 + $0x28] sm:$0xff]   ;;  %v576_v27 = vld [vmem:[%s789_s5 + $0x20] sm:$0xff]   ;;  %v577_v28 = vld [vmem:[%s789_s5 + $0x58] sm:$0xff]   ;;  %v759_v38 = vsub.s32 0, %v50_v37  ;;  %v764_v40 = vsub.s32 1, %v50_v37 }
  0x1a   :  { %v578_v29 = vld [vmem:[%s789_s5 + $0x18] sm:$0xff]   ;;  %v579_v30 = vld [vmem:[%s789_s5 + $0x50] sm:$0xff]   ;;  %v581_v32 = vld [vmem:[%s789_s5 + $0x48] sm:$0xff]  }
  0x1b   :  { %152 = vmatpush1.bf16.msra.mxu0 %v565_v14  ;;  %v580_v31 = vld [vmem:[%s789_s5 + $0x10] sm:$0xff]   ;;  %v582_v33 = vld [vmem:[%s789_s5 + $0x8] sm:$0xff]   ;;  %v583_v34 = vld [vmem:[%s789_s5 + $0x40] sm:$0xff]  }
  0x1c   :  { %153 = vmatprep.subr.bf16.mxu0 %v566_v15  ;;  %522 = vmatpush3.bf16.msra.mxu1 %v572_v23  ;;  %v584_v35 = vld [vmem:[%s789_s5] sm:$0xff]  }
  0x1d   :  { %523 = vmatprep.subr.bf16.mxu1 %v573_v24  ;;  %v47_v39 = vld [vmem:[%s786_s2] sm:$0x3] }
  0x1e   :  { %v52_v42 = vrot.slane %v47_v39, %v759_v38  ;;  %v56_v44 = vrot.slane %v47_v39, %v764_v40 }
  0x1f   :  { %154 = vmatpush1.bf16.msra.mxu0 %v568_v16 }
  0x20   :  { %524 = vmatpush3.bf16.msra.mxu1 %v574_v25 }
  0x21   :  { %525 = vmatprep.subr.bf16.mxu1 %v575_v26 }
  0x22   :  { %172 = vmatmul.mubr.bf16.vlgmr.msra.gmra.mxu0 %v30_v19 }
  0x24   :  { %526 = vmatpush3.bf16.msra.mxu1 %v576_v27 }
  0x25   :  { %527 = vmatprep.subr.bf16.mxu1 %v577_v28 }
  0x28   :  { %528 = vmatpush3.bf16.msra.mxu1 %v578_v29  ;;  %v230_v29 = vld [vmem:[%s787_s3] sm:$0x3] }
  0x29   :  { %529 = vmatprep.subr.bf16.mxu1 %v579_v30  ;;  %v246_v30 = vld [vmem:[%s788_s4] sm:$0x3] }
  0x2a   :  { %v251_v36 = vrot.slane %v246_v30, %v759_v38  ;;  %v255_v39 = vrot.slane %v246_v30, %v764_v40 }
  0x2c   :  { %530 = vmatpush3.bf16.msra.mxu1 %v580_v31  ;;  %v235_v31 = vrot.slane %v230_v29, %v759_v38 }
  0x2d   :  { %531 = vmatprep.subr.bf16.mxu1 %v581_v32 }
  0x30   :  { %532 = vmatpush3.bf16.msra.mxu1 %v582_v33 }
  0x31   :  { %533 = vmatprep.subr.bf16.mxu1 %v583_v34 }
  0x34   :  { %534 = vmatpush3.bf16.msra.mxu1 %v584_v35  ;;  %v239_v35 = vrot.slane %v230_v29, %v764_v40 }
  0xe2   :  { %v173_v41 = vpop.f32.mrf.mxu0 }
  0xe3   :  { %v174_v46 = vadd.f32 %v173_v41, %v52_v42 }
  0xe4   :  { %v175_v43 = vpop.f32.mrf.mxu0 }
  0xe5   :  { %v176_v49 = vadd.f32 %v175_v43, %v56_v44 }
  0xe6   :  { %v177_v45 = vpop.f32.mrf.mxu0 }
  0xe7   :  { %v178_v47 = vadd.f32 %v177_v45, %v52_v42 }
  0xe8   :  { %v179_v48 = vpop.f32.mrf.mxu0 }
  0xe9   :  { %v182_v50 = vadd.f32 %v178_v47, %v174_v46  ;;  %v180_v51 = vadd.f32 %v179_v48, %v56_v44 }
  0xeb   :  { %v183_v52 = vrot.slane %v182_v50, 4  ;;  %v189_v53 = vadd.f32 %v180_v51, %v176_v49 }
  0xed   :  { %v184_v54 = vadd.f32 %v183_v52, %v182_v50  ;;  %v190_v55 = vrot.slane %v189_v53, 4 }
  0xef   :  { %v185_v56 = vrot.slane %v184_v54, 2  ;;  %v191_v57 = vadd.f32 %v190_v55, %v189_v53 }
  0xf1   :  { %v186_v58 = vadd.f32 %v185_v56, %v184_v54  ;;  %v192_v59 = vrot.slane %v191_v57, 2 }
  0xf3   :  { %v187_v60 = vrot.slane %v186_v58, 1  ;;  %v193_v61 = vadd.f32 %v192_v59, %v191_v57  ;;  %v502_v59 = vld [vmem:[%s790_s6] ss:$0 sm:$0xff]  ;;  %s614_s6 = smov [#allocation2]  }
  0xf4   :  { %s475_s23 = sshll.u32 %s614_s6, 4  ;;  %s476_s23 = int_to_ptr.vmem [resolvable:$true] %s475_s23 }
  0xf5   :  { %v188_v62 = vadd.f32 %v187_v60, %v186_v58  ;;  %v194_v63 = vrot.slane %v193_v61, 1  ;;  %s591_s24 = scalar_lea.vmem %s476_s23, 256  ;;  %p596_p1 = scmp.lt.s32.totalorder %s476_s23, %s476_s23 }
  0xf6   :  { %p592_p0 = scmp.ne.s32.totalorder %s476_s23, %s591_s24  ;;  %p597_p2 = scmp.lt.s32.totalorder %s591_s24, %s591_s24 }
  0xf7   :  { %v196_v0 = vmul.f32 0.0625, %v188_v62  ;;  %v195_v1 = vadd.f32 %v194_v63, %v193_v61 }
  0xf8   :  { %p598_p3 = por %p597_p2, %p596_p1 }
  0xf9   :  { %v198_v2 = vsub.f32 %v174_v46, %v196_v0  ;;  %v200_v3 = vsub.f32 %v178_v47, %v196_v0  ;;  %v197_v4 = vmul.f32 0.0625, %v195_v1 }
  0xfa   :  { %p599_p4 = pnand %p598_p3, %p592_p0 }
  0xfb   :  { %v202_v5 = vmul.f32 %v198_v2, %v198_v2  ;;  %v204_v6 = vmul.f32 %v200_v3, %v200_v3  ;;  %v199_v7 = vsub.f32 %v176_v49, %v197_v4  ;;  %v201_v8 = vsub.f32 %v180_v51, %v197_v4 }
  0xfd   :  { %v206_v9 = vadd.f32 %v204_v6, %v202_v5  ;;  %v203_v10 = vmul.f32 %v199_v7, %v199_v7  ;;  %v205_v11 = vmul.f32 %v201_v8, %v201_v8 }
  0xff   :  { %v207_v12 = vrot.slane %v206_v9, 4  ;;  %v213_v13 = vadd.f32 %v205_v11, %v203_v10 }
 0x101   :  { %v208_v14 = vadd.f32 %v207_v12, %v206_v9  ;;  %v214_v15 = vrot.slane %v213_v13, 4 }
 0x103   :  { %v209_v16 = vrot.slane %v208_v14, 2  ;;  %v215_v17 = vadd.f32 %v214_v15, %v213_v13 }
 0x105   :  { %v210_v18 = vadd.f32 %v209_v16, %v208_v14  ;;  %v216_v19 = vrot.slane %v215_v17, 2 }
 0x107   :  { %v211_v20 = vrot.slane %v210_v18, 1  ;;  %v217_v21 = vadd.f32 %v216_v19, %v215_v17 }
 0x109   :  { %v212_v22 = vadd.f32 %v211_v20, %v210_v18  ;;  %v218_v23 = vrot.slane %v217_v21, 1 }
 0x10b   :  { %v220_v24 = vmul.f32 0.0625, %v212_v22  ;;  %v219_v25 = vadd.f32 %v218_v23, %v217_v21 }
 0x10d   :  { %v222_v26 = vadd.f32 1e-05, %v220_v24  ;;  %v221_v27 = vmul.f32 0.0625, %v219_v25 }
 0x10f   :  { %585 = vrsqrt.f32 %v222_v26  ;;  %v223_v28 = vadd.f32 1e-05, %v221_v27 }
 0x111   :  { %587 = vrsqrt.f32 %v223_v28 }
 0x11c   :  { %v586_v32 = vpop.eup %585 }
 0x11d   :  { %v226_v33 = vmul.f32 %v586_v32, %v198_v2  ;;  %v228_v34 = vmul.f32 %v586_v32, %v200_v3 }
 0x11e   :  { %v588_v37 = vpop.eup %587 }
 0x11f   :  { %v244_v41 = vmul.f32 %v235_v31, %v228_v34  ;;  %v229_v42 = vmul.f32 %v588_v37, %v201_v8  ;;  %v227_v43 = vmul.f32 %v588_v37, %v199_v7  ;;  %v242_v44 = vmul.f32 %v235_v31, %v226_v33 }
 0x121   :  { %v243_v45 = vmul.f32 %v239_v35, %v227_v43  ;;  %v245_v46 = vmul.f32 %v239_v35, %v229_v42  ;;  %v258_v47 = vadd.f32 %v251_v36, %v242_v44  ;;  %v260_v48 = vadd.f32 %v251_v36, %v244_v41 }
 0x123   :  { %v259_v49 = vadd.f32 %v255_v39, %v243_v45  ;;  %v261_v50 = vadd.f32 %v255_v39, %v245_v46  ;;  %v262_v51 = vmax.f32 %v258_v47, 0.0  ;;  %v264_v52 = vmax.f32 %v260_v48, 0.0 }
 0x125   :  { %v263_v53 = vmax.f32 %v259_v49, 0.0  ;;  %v265_v54 = vmax.f32 %v261_v50, 0.0  ;;  %v266_v56 = vpack.c.bf16 %v264_v52, %v262_v51 }
 0x127   :  { %v267_v55 = vpack.c.bf16 %v265_v54, %v263_v53 }
 0x129   :  { %435 = vmatprep.mubr.bf16.mxu1 %v267_v55 }
 0x12a   :  { %436 = vmatmul.mubr.bf16.vlgmr.msra.gmra.mxu1 %v266_v56 }
 0x1ea   :  { %v535_v38 = vpop.f32.mrf.mxu1 }
 0x1ec   :  { %v536_v40 = vpop.f32.mrf.mxu1 }
 0x1ed   :  { %v537_v58 = vadd.f32 %v536_v40, %v535_v38 }
 0x1ee   :  { %v538_v57 = vpop.f32.mrf.mxu1 }
 0x1ef   :  { %v438_v62 = vadd.f32 %v537_v58, %v502_v59 }
 0x1f0   :  { %v539_v60 = vpop.f32.mrf.mxu1 }
 0x1f1   :  { %v540_v61 = vadd.f32 %v539_v60, %v538_v57 }
 0x1f3   :  { %v441_v63 = vadd.f32 %v540_v61, %v502_v59 }
 0x1f5   :  { %v444_v0 = vadd.f32 %v441_v63, %v438_v62 }
 0x1f7   :  { %v445_v1 = vrot.slane %v444_v0, 4 }
 0x1f9   :  { %v446_v2 = vadd.f32 %v445_v1, %v444_v0 }
 0x1fb   :  { %v447_v3 = vrot.slane %v446_v2, 2 }
 0x1fd   :  { %v448_v4 = vadd.f32 %v447_v3, %v446_v2 }
 0x1ff   :  { %v449_v5 = vrot.slane %v448_v4, 1 }
 0x201   :  { %v450_v6 = vadd.f32 %v449_v5, %v448_v4 }
 0x203   :  { %v451_v7 = vmul.f32 0.0625, %v450_v6 }
 0x205   :  { %v452_v8 = vsub.f32 %v438_v62, %v451_v7  ;;  %v453_v9 = vsub.f32 %v441_v63, %v451_v7 }
 0x207   :  { %v454_v10 = vmul.f32 %v452_v8, %v452_v8  ;;  %v455_v11 = vmul.f32 %v453_v9, %v453_v9 }
 0x209   :  { %v456_v12 = vadd.f32 %v455_v11, %v454_v10 }
 0x20b   :  { %v457_v13 = vrot.slane %v456_v12, 4 }
 0x20d   :  { %v458_v14 = vadd.f32 %v457_v13, %v456_v12 }
 0x20f   :  { %v459_v15 = vrot.slane %v458_v14, 2 }
 0x211   :  { %v460_v16 = vadd.f32 %v459_v15, %v458_v14 }
 0x213   :  { %v461_v17 = vrot.slane %v460_v16, 1 }
 0x215   :  { %v462_v18 = vadd.f32 %v461_v17, %v460_v16 }
 0x217   :  { %v463_v19 = vmul.f32 0.0625, %v462_v18 }
 0x219   :  { %v464_v20 = vadd.f32 1e-05, %v463_v19 }
 0x21b   :  { %589 = vrsqrt.f32 %v464_v20 }
 0x228   :  { %v590_v21 = vpop.eup %589 }
 0x229   :  { %v467_v22 = vmul.f32 %v590_v21, %v453_v9  ;;  %v466_v23 = vmul.f32 %v590_v21, %v452_v8 }
 0x22b   :  { %469 = vst [vmem:[#allocation2 + $0x8] sm:$0xff] %v467_v22  ;;  %468 = vst [vmem:[#allocation2] sm:$0xff] %v466_v23 }
 0x22c   :  { %602 = shalt.err (!%p599_p4)
}
 0x22d   :  { %s615_s25 = smov 128   ;;  %s616_s26 = smov 8  }
 0x22e   :  { %481 = dma.vmem_to_hbm [thread:$0]  %s476_s23, 256, %s791_s7, [#allocation3], %s615_s25, %s615_s25, %s616_s26  }
 0x22f   :  { %611 = dma.done.wait [#allocation3], 256  }
 0x230   :  { %612 = vsyncadd [#allocation3], 4294967040 }
 0x231   :  { %485 = vsyncpa [#allocation3], 1 }

</bundles_post_ra>
